<compile_context>
chip_gen: v6e
topology: v6e:2x2x1
jax: 0.10.0
libtpu: 0.0.40
codegen_flags: <defaults>
</compile_context>

<pallas_src>
import math

import jax
import jax.numpy as jnp
from jax.experimental import pallas as pl
from jax.experimental.pallas import tpu as pltpu


def _round_up(x: int, m: int) -> int:
    return (x + m - 1) // m * m


def _pick_tile(total_aligned: int, align: int, cap: int,
               max_waste_frac: float = 1.0 / 16.0) -> int:
    """Largest tile (multiple of `align`, <= cap) whose padding waste is small.

    `total_aligned` is already a multiple of `align`, so `align` itself always
    gives zero waste and the scan is guaranteed to return.
    """
    cap = max(align, min(cap, total_aligned))
    for t in range(cap, align - 1, -align):
        waste = _round_up(total_aligned, t) - total_aligned
        if waste <= max_waste_frac * total_aligned:
            return t
    return align  # unreachable fallback


def _make_random_layer_kernel(num_inputs: int, tile_n: int, scale: float,
                              weights_resident: bool):
    """Fused kernel: k matmuls (MXU, f32 acc) + elementwise product (VPU)."""

    def kernel(*refs):
        # refs = (x_0..x_{k-1}, w_0..w_{k-1}, out)
        x_refs = refs[:num_inputs]
        w_refs = refs[num_inputs:2 * num_inputs]
        out_ref = refs[2 * num_inputs]

        if weights_resident:
            # Weights are VMEM-resident: slice the lane-aligned column panel.
            col = pl.multiple_of(pl.program_id(1) * tile_n, 128)

            def w_tile(i):
                return w_refs[i][:, pl.ds(col, tile_n)]
        else:
            # Weights arrive as per-grid-step column panels via BlockSpec.
            def w_tile(i):
                return w_refs[i][...]

        acc = jnp.dot(x_refs[0][...], w_tile(0),
                      preferred_element_type=jnp.float32)
        for i in range(1, num_inputs):
            y_i = jnp.dot(x_refs[i][...], w_tile(i),
                          preferred_element_type=jnp.float32)
            acc = acc * y_i

        # 1/O^(1/k) applied in-kernel (VPU slot has plenty of slack here).
        acc = acc * jnp.float32(scale)
        out_ref[...] = acc.astype(out_ref.dtype)

    return kernel


def random_layer_forward(input_list, random_matrices, output_dim, *,
                         tile_m=256, tile_n=1024,
                         compute_dtype=jnp.bfloat16, out_dtype=None,
                         vmem_limit_bytes=None):
    """Pallas implementation of RandomLayer.forward.

    input_list:       list of [N, D_i] float arrays
    random_matrices:  list of [D_i, output_dim] float arrays
    compute_dtype:    MXU input dtype (bf16 default; accumulation is always f32)
    out_dtype:        output dtype (defaults to compute_dtype)
    """
    num_inputs = len(input_list)
    assert num_inputs == len(random_matrices) and num_inputs >= 1
    assert tile_m % 8 == 0 and tile_n % 128 == 0
    if out_dtype is None:
        out_dtype = compute_dtype

    n = int(input_list[0].shape[0])
    dims = [int(w.shape[0]) for w in random_matrices]
    assert all(int(x.shape[0]) == n for x in input_list)
    assert all(int(x.shape[1]) == d for x, d in zip(input_list, dims))
    assert all(int(w.shape[1]) == output_dim for w in random_matrices)

    # --- Tile selection (bounded padding waste, (8,128) aligned) -------------
    n_pad8 = _round_up(n, 8)
    o_pad128 = _round_up(output_dim, 128)
    tm = _pick_tile(n_pad8, 8, tile_m)
    tn = _pick_tile(o_pad128, 128, tile_n)
    n_pad = _round_up(n_pad8, tm)
    o_pad = _round_up(o_pad128, tn)

    # Guarantee >= 2 grid blocks so the 2nd TensorCore (v7x) has work.
    if (n_pad // tm) * (o_pad // tn) < 2:
        if o_pad128 >= 256:
            tn = max(128, ((tn // 2) // 128) * 128)
            o_pad = _round_up(o_pad128, tn)
        elif n_pad8 >= 16:
            tm = max(8, ((tm // 2) // 8) * 8)
            n_pad = _round_up(n_pad8, tm)

    grid = (n_pad // tm, o_pad // tn)

    cbytes = jnp.dtype(compute_dtype).itemsize
    obytes = jnp.dtype(out_dtype).itemsize
    sum_d = sum(dims)

    # Keep weights fully VMEM-resident (single HBM read for the whole grid) as
    # long as their (double-buffered) footprint is modest; otherwise fall back
    # to column-tiled panels to stay friendly to v7x's 64 MiB VMEM.
    weights_resident = (2 * sum_d * o_pad * cbytes) <= 8 * 1024 * 1024

    scale = 1.0 / math.pow(float(output_dim), 1.0 / num_inputs)

    # --- Host-side prep: cast to MXU dtype, pad ragged edges with zeros ------
    # TODO(synk): in a real training loop store the params in `compute_dtype`
    # (and pre-padded) so these casts/pads are not re-run every call.
    xs = []
    for x in input_list:
        x = x.astype(compute_dtype)
        if n_pad != n:
            x = jnp.pad(x, ((0, n_pad - n), (0, 0)))
        xs.append(x)

    ws = []
    for w in random_matrices:
        w = w.astype(compute_dtype)
        if o_pad != output_dim:
            w = jnp.pad(w, ((0, 0), (0, o_pad - output_dim)))
        ws.append(w)

    # --- BlockSpecs -----------------------------------------------------------
    # x_i: one row tile, full (small) contraction dim; block index constant
    # along the column axis -> each row tile is fetched from HBM exactly once.
    x_specs = [pl.BlockSpec((tm, d), lambda i, j: (i, 0)) for d in dims]
    if weights_resident:
        # Constant block index -> each weight DMA'd from HBM exactly once.
        w_specs = [pl.BlockSpec((d, o_pad), lambda i, j: (0, 0)) for d in dims]
    else:
        # Column panels: VMEM use capped at 2*sum_d*tn regardless of output_dim.
        w_specs = [pl.BlockSpec((d, tn), lambda i, j: (0, j)) for d in dims]
    # Lane-dense output tile (tn is a multiple of 128).
    out_spec = pl.BlockSpec((tm, tn), lambda i, j: (i, j))

    # --- VMEM budget (double-buffered tiles + f32 intermediates) -------------
    w_vmem = 2 * sum_d * (o_pad if weights_resident else tn) * cbytes
    x_vmem = 2 * tm * sum_d * cbytes
    out_vmem = 2 * tm * tn * obytes
    interm_vmem = (num_inputs + 1) * tm * tn * 4  # f32 acc + y_i temporaries
    if vmem_limit_bytes is None:
        est = w_vmem + x_vmem + out_vmem + interm_vmem
        vmem_limit_bytes = min(64 * 1024 * 1024,
                               max(32 * 1024 * 1024, 2 * est))

    n_row_tiles = n_pad // tm
    w_reads = sum_d * o_pad * (1 if weights_resident else n_row_tiles)
    cost = pl.CostEstimate(
        flops=2 * n_pad * o_pad * sum_d + num_inputs * n_pad * o_pad,
        transcendentals=0,
        bytes_accessed=cbytes * (n_pad * sum_d + w_reads)
        + obytes * n_pad * o_pad,
    )

    out = pl.pallas_call(
        _make_random_layer_kernel(num_inputs, tn, scale, weights_resident),
        out_shape=jax.ShapeDtypeStruct((n_pad, o_pad), out_dtype),
        grid_spec=pltpu.PrefetchScalarGridSpec(
            num_scalar_prefetch=0,
            grid=grid,
            in_specs=x_specs + w_specs,
            out_specs=out_spec,
        ),
        compiler_params=pltpu.CompilerParams(
            dimension_semantics=("parallel", "parallel"),
            vmem_limit_bytes=vmem_limit_bytes,
        ),
        cost_estimate=cost,
    )(*xs, *ws)

    if n_pad != n or o_pad != output_dim:
        out = out[:n, :output_dim]
    return out


def random_layer_reference(input_list, random_matrices, output_dim):
    """Pure-JAX reference mirroring the PyTorch forward (f32)."""
    ys = [jnp.dot(x, w, preferred_element_type=jnp.float32)
          for x, w in zip(input_list, random_matrices)]
    out = ys[0] / math.pow(float(output_dim), 1.0 / len(ys))
    for y in ys[1:]:
        out = out * y
    return out


def _bf16_matched_reference(input_list, random_matrices, output_dim):
    """Reference matching the kernel's bf16-in / f32-acc / bf16-out numerics."""
    ys = [jnp.dot(x.astype(jnp.bfloat16), w.astype(jnp.bfloat16),
                  preferred_element_type=jnp.float32)
          for x, w in zip(input_list, random_matrices)]
    out = ys[0]
    for y in ys[1:]:
        out = out * y
    out = out * jnp.float32(1.0 / math.pow(float(output_dim), 1.0 / len(ys)))
    return out.astype(jnp.bfloat16)


if __name__ == "__main__":
    # Small deterministic setup consistent with RandomLayer.__init__:
    #   input_dim_list = [32, 16], output_dim = 1024 (module default), batch = 8
    key = jax.random.PRNGKey(0)
    input_dim_list = [32, 16]
    output_dim = 1024
    batch = 8

    keys = jax.random.split(key, 2 * len(input_dim_list))
    # Deterministic "random_matrix" parameters (stand-in for torch.randn init).
    random_matrices = [
        jax.random.normal(keys[i], (d, output_dim), dtype=jnp.float32)
        for i, d in enumerate(input_dim_list)
    ]
    # Example inputs.
    input_list = [
        jax.random.normal(keys[len(input_dim_list) + i], (batch, d),
                          dtype=jnp.float32)
        for i, d in enumerate(input_dim_list)
    ]

    # 1) Strict-numerics f32 path vs f32 reference.
    out_f32 = random_layer_forward(input_list, random_matrices, output_dim,
                                   compute_dtype=jnp.float32,
                                   out_dtype=jnp.float32)
    out_f32 = jax.block_until_ready(out_f32)
    ref_f32 = random_layer_reference(input_list, random_matrices, output_dim)
    assert out_f32.shape == (batch, output_dim)
    assert jnp.allclose(out_f32, ref_f32, atol=1e-4, rtol=1e-4), \
        "f32 kernel mismatch vs reference"

    # 2) Default fast path: bf16 MXU inputs + bf16 output (f32 accumulation),
    #    validated against a numerics-matched bf16 reference.
    out_bf16 = random_layer_forward(input_list, random_matrices, output_dim)
    out_bf16 = jax.block_until_ready(out_bf16)
    ref_bf16 = _bf16_matched_reference(input_list, random_matrices, output_dim)
    assert out_bf16.shape == (batch, output_dim)
    assert out_bf16.dtype == jnp.bfloat16
    assert jnp.allclose(out_bf16.astype(jnp.float32),
                        ref_bf16.astype(jnp.float32),
                        atol=2e-2, rtol=2e-2), "bf16 kernel mismatch vs reference"

    print("KERNEL_OK")
</pallas_src>

<mosaic_0001>
module attributes {stable_mosaic.version = 11 : i64} {
  func.func @kernel(%arg0: i32, %arg1: i32, %arg2: memref<8x32xf32, #tpu.memory_space<vmem>>, %arg3: memref<8x16xf32, #tpu.memory_space<vmem>>, %arg4: memref<32x1024xf32, #tpu.memory_space<vmem>>, %arg5: memref<16x1024xf32, #tpu.memory_space<vmem>>, %arg6: memref<8x512xf32, #tpu.memory_space<vmem>>) attributes {dimension_semantics = [#tpu.dimension_semantics<parallel>, #tpu.dimension_semantics<parallel>], iteration_bounds = array<i64: 1, 2>, scalar_prefetch = 0 : i64, scratch_operands = 0 : i64, tpu.core_type = #tpu.core_type<tc>, window_params = [{transform_indices = @transform_0, window_bounds = array<i64: 8, 32>}, {transform_indices = @transform_1, window_bounds = array<i64: 8, 16>}, {pipeline_mode = #tpu.pipeline_mode<synchronous>, transform_indices = @transform_2, window_bounds = array<i64: 32, 1024>}, {pipeline_mode = #tpu.pipeline_mode<synchronous>, transform_indices = @transform_3, window_bounds = array<i64: 16, 1024>}, {transform_indices = @transform_4, window_bounds = array<i64: 8, 512>}]} {
    %c512_i32 = arith.constant 512 : i32
    %0 = arith.muli %arg1, %c512_i32 : i32
    %1 = tpu.assume_multiple %0, 128 : i32
    %c0 = arith.constant 0 : index
    %c0_0 = arith.constant 0 : index
    %2 = vector.load %arg2[%c0, %c0_0] : memref<8x32xf32, #tpu.memory_space<vmem>>, vector<8x32xf32>
    %c0_1 = arith.constant 0 : index
    %3 = arith.index_cast %1 : i32 to index
    %4 = vector.load %arg4[%c0_1, %3] : memref<32x1024xf32, #tpu.memory_space<vmem>>, vector<32x512xf32>
    %cst = arith.constant dense<0.000000e+00> : vector<8x512xf32>
    %5 = tpu.matmul %2, %4, %cst {dimension_numbers = #tpu.dot_dimension_numbers<[1], [0], [0], [1], [0, 0, 1, 1], [], []>} : vector<8x32xf32>, vector<32x512xf32>, vector<8x512xf32> -> vector<8x512xf32>
    %c0_2 = arith.constant 0 : index
    %c0_3 = arith.constant 0 : index
    %6 = vector.load %arg3[%c0_2, %c0_3] : memref<8x16xf32, #tpu.memory_space<vmem>>, vector<8x16xf32>
    %c0_4 = arith.constant 0 : index
    %7 = arith.index_cast %1 : i32 to index
    %8 = vector.load %arg5[%c0_4, %7] : memref<16x1024xf32, #tpu.memory_space<vmem>>, vector<16x512xf32>
    %cst_5 = arith.constant dense<0.000000e+00> : vector<8x512xf32>
    %9 = tpu.matmul %6, %8, %cst_5 {dimension_numbers = #tpu.dot_dimension_numbers<[1], [0], [0], [1], [0, 0, 1, 1], [], []>} : vector<8x16xf32>, vector<16x512xf32>, vector<8x512xf32> -> vector<8x512xf32>
    %10 = arith.mulf %5, %9 : vector<8x512xf32>
    %cst_6 = arith.constant 3.125000e-02 : f32
    %11 = vector.broadcast %cst_6 : f32 to vector<8x512xf32>
    %12 = arith.mulf %10, %11 : vector<8x512xf32>
    %c0_7 = arith.constant 0 : index
    %c0_8 = arith.constant 0 : index
    %13 = vector.load %arg6[%c0_7, %c0_8] : memref<8x512xf32, #tpu.memory_space<vmem>>, vector<8x512xf32>
    tpu.vector_store %arg6[%c0_7, %c0_8], %12 {strides = array<i32>} : memref<8x512xf32, #tpu.memory_space<vmem>>, vector<8x512xf32>,
    return
  }
  func.func @transform_0(%arg0: i32, %arg1: i32) -> (i32, i32) {
    %c0_i32 = arith.constant 0 : i32
    %c0_i32_0 = arith.constant 0 : i32
    return %arg0, %c0_i32 : i32, i32
  }
  func.func @transform_1(%arg0: i32, %arg1: i32) -> (i32, i32) {
    %c0_i32 = arith.constant 0 : i32
    %c0_i32_0 = arith.constant 0 : i32
    return %arg0, %c0_i32 : i32, i32
  }
  func.func @transform_2(%arg0: i32, %arg1: i32) -> (i32, i32) {
    %c0_i32 = arith.constant 0 : i32
    %c0_i32_0 = arith.constant 0 : i32
    %c0_i32_1 = arith.constant 0 : i32
    return %c0_i32, %c0_i32_0 : i32, i32
  }
  func.func @transform_3(%arg0: i32, %arg1: i32) -> (i32, i32) {
    %c0_i32 = arith.constant 0 : i32
    %c0_i32_0 = arith.constant 0 : i32
    %c0_i32_1 = arith.constant 0 : i32
    return %c0_i32, %c0_i32_0 : i32, i32
  }
  func.func @transform_4(%arg0: i32, %arg1: i32) -> (i32, i32) {
    %c0_i32 = arith.constant 0 : i32
    return %arg0, %arg1 : i32, i32
  }
}

</mosaic_0001>

<bundles_post_ra>
// kernel: tpu_custom_call.1
= control target key start
LH: loop header
LB: loop body
LE: loop exit
PB: predicated region body
PF: predicated region fallthrough
CT: control target
= control target key end

     0   :  { %9 = vsyncpa [#allocation3], 0  ;;  %s1248_s0 = inlined_call_operand.hbm [shape: f32[8,32], index: 0, kind: input, shape index: {}]   ;;  %s1249_s1 = inlined_call_operand.hbm [shape: f32[8,16], index: 1, kind: input, shape index: {}]   ;;  %s1250_s2 = inlined_call_operand.hbm [shape: f32[32,1024], index: 2, kind: input, shape index: {}]   ;;  %s1251_s3 = inlined_call_operand.hbm [shape: f32[16,1024], index: 3, kind: input, shape index: {}]   ;;  %s1252_s4 = inlined_call_operand.hbm [shape: f32[8,1024], index: 4, kind: output, shape index: {}]  }
   0x1   :  { %10 = vsyncpa [#allocation6], 0 }
   0x2   :  { %11 = vsyncpa [#allocation9], 0 }
   0x3   :  { %12 = vsyncpa [#allocation4], 0 }
   0x4   :  { %14 = vsyncpa [#allocation4 + $0x1], 0  ;;  %s1073_s15 = smov 0   ;;  %s1075_s16 = smov 0  }
   0x5   :  { %s1077_s17 = smov 0   ;;  %s1079_s18 = smov 0  }
   0x6   :  { %s1081_s19 = smov 0   ;;  %s1083_s20 = smov 0  }
   0x7 LB: > { %s721_s21 = sadd.s32 4294967295, %s1038_s20   ;;  %s722_s22 = sadd.s32 4294967294, %s1038_s20   ;;  %s1038_s20 = sphi %s1083_s20, %s20_s20   ;;  %s1034_s19 = sphi %s1081_s19, %s1270_s19   ;;  %s1030_s18 = sphi %s1079_s18, %s1269_s18   ;;  %s1026_s17 = sphi %s1077_s17, %s1268_s17   ;;  %s1022_s16 = sphi %s1075_s16, %s1267_s16   ;;  %s1018_s15 = sphi %s1073_s15, %s1266_s15  }
   0x8   : > { %s29_s23 = sadd.s32 1, %s1034_s19  ;;  %s135_s24 = sadd.s32 1, %s1026_s17 }
   0x9   : > { %p30_p0 = scmp.ge.s32.totalorder %s29_s23, 2  ;;  %p145_p1 = scmp.ne.s32.totalorder %s1026_s17, %s1022_s16 }
   0xa   : > { %p146_p2 = scmp.eq.s32.totalorder %s721_s21, 1  ;;  %p151_p3 = scmp.ne.s32.totalorder %s1022_s16, %s1018_s15 }
   0xb   : > { %s1272_s23 = smov (%p30_p0, %s29_s23), 0  ;;  %p152_p5 = scmp.eq.s32.totalorder %s722_s22, 1 }
   0xc   : > { %p1113_p4 = por %p146_p2, %p145_p1  ;;  %s131_s26 = ssub.s32 %s1034_s19, %s1272_s23 }
   0xd   : > { %p723_p6 = scmp.ge.s32.totalorder %s1038_s20, 1  ;;  %p133_p7 = scmp.eq.s32.totalorder %s131_s26, 0 }
   0xe   : > { %s1257_s25 = scalar_select %p1113_p4, 1, 0 }
   0xf   : > { %p1120_p8 = por %p152_p5, %p151_p3  ;;  %p159_p9 = scmp.lt.s32.totalorder %s1038_s20, 3 }
  0x10   : > { %s1126_s28 = scalar_select %p133_p7, %s1026_s17, %s135_s24  }
  0x11   : > { %s1258_s27 = scalar_select %p1120_p8, 1, 0 }
  0x12   : > { %p1128_p10 = pnand %p723_p6, %p159_p9  ;;  %p1132_p11 = scmp.eq.s32.totalorder %s721_s21, 0 }
  0x13   : > { %s1040_s5 = smov [#allocation5]   ;;  %s1041_s8 = smov [#allocation2]  }
  0x14   : > { %s1259_s29 = scalar_select %p1128_p10, 1, 0 }
  0x15   : > { %s1260_s30 = scalar_select %p1132_p11, 1, 0 }
  0x16   : > { %p765_p12 = pneg %p1128_p10  ;;  %s187_s6 = sshll.u32 %s1040_s5, 4  ;;  %s188_s6 = int_to_ptr.vmem [resolvable:$true] %s187_s6 }
  0x17   : > { %s174_s9 = sshll.u32 %s1041_s8, 4  ;;  %s857_s10 = scalar_lea.vmem %s188_s6, 128  ;;  %s175_s9 = int_to_ptr.vmem [resolvable:$true] %s174_s9 }
  0x18   : > { %p1140_p13 = pnand %p1132_p11, %p765_p12  ;;  %p858_p1 = scmp.ne.s32.totalorder %s188_s6, %s857_s10 }
  0x19   : > { %p865_p5 = scmp.lt.s32.totalorder %s188_s6, %s188_s6  ;;  %p866_p6 = scmp.lt.s32.totalorder %s857_s10, %s857_s10 }
  0x1a   : > { %p848_p0 = pneg %p1140_p13 }
  0x1b   : > { %p867_p7 = por %p866_p6, %p865_p5 }
  0x1c   : > { %p860_p2 = pnand %p858_p1, %p848_p0 }
  0x1e   : > { %p861_p3 = pneg %p860_p2 }
  0x20   : > { %p868_p9 = pnand %p867_p7, %p861_p3 }
  0x22   : > { %871 = shalt.err (!%p868_p9)
}
  0x23   : > { %771 = dma.hbm_to_vmem [thread:$0]  (!%p1140_p13), %s1249_s1, 128, %s188_s6, [#allocation6]  }
  0x24   : > { %s883_s13 = scalar_lea.vmem %s175_s9, 128  ;;  %p891_p1 = scmp.lt.s32.totalorder %s175_s9, %s175_s9 }
  0x25   : > { %p884_p12 = scmp.ne.s32.totalorder %s175_s9, %s883_s13  ;;  %p892_p2 = scmp.lt.s32.totalorder %s883_s13, %s883_s13 }
  0x27   : > { %p886_p8 = pnand %p884_p12, %p848_p0  ;;  %p893_p11 = por %p892_p2, %p891_p1 }
  0x29   : > { %p887_p4 = pneg %p886_p8 }
  0x2b   : > { %p894_p10 = pnand %p893_p11, %p887_p4 }
  0x2d   : > { %897 = shalt.err (!%p894_p10)
}
  0x2e   : > { %768 = dma.hbm_to_vmem [thread:$0]  (!%p1140_p13), %s1248_s0, 128, %s175_s9, [#allocation3]  }
  0x2f   : > { %s1042_s22 = smov [#allocation7]  }
  0x30   : > { %s197_s24 = sshll.u32 %s1042_s22, 4  ;;  %s198_s24 = int_to_ptr.vmem [resolvable:$true] %s197_s24 }
  0x31   : > { %s909_s26 = scalar_lea.vmem %s198_s24, 4096  ;;  %p917_p6 = scmp.lt.s32.totalorder %s198_s24, %s198_s24 }
  0x32   : > { %p910_p3 = scmp.ne.s32.totalorder %s198_s24, %s909_s26  ;;  %p918_p7 = scmp.lt.s32.totalorder %s909_s26, %s909_s26 }
  0x34   : > { %p912_p8 = pnand %p910_p3, %p848_p0  ;;  %p919_p4 = por %p918_p7, %p917_p6 }
  0x36   : > { %p913_p5 = pneg %p912_p8 }
  0x38   : > { %p920_p10 = pnand %p919_p4, %p913_p5 }
  0x3a   : > { %923 = shalt.err (!%p920_p10)
}
  0x3b   : > { %s1043_s5 = smov 1024   ;;  %s1044_s6 = smov 64  }
  0x3c   : > { %774 = dma.hbm_to_vmem [thread:$0]  (!%p1140_p13), %s1250_s2, 4096, %s198_s24, [#allocation6], %s1043_s5, %s1043_s5, %s1044_s6  }
  0x3d   : > { %s1045_s10 = smov [#allocation8]  }
  0x3e   : > { %s210_s11 = sshll.u32 %s1045_s10, 4  ;;  %s211_s11 = int_to_ptr.vmem [resolvable:$true] %s210_s11 }
  0x3f   : > { %s935_s12 = scalar_lea.vmem %s211_s11, 2048  ;;  %p943_p1 = scmp.lt.s32.totalorder %s211_s11, %s211_s11 }
  0x40   : > { %p936_p11 = scmp.ne.s32.totalorder %s211_s11, %s935_s12  ;;  %p944_p2 = scmp.lt.s32.totalorder %s935_s12, %s935_s12 }
  0x42   : > { %p938_p9 = pnand %p936_p11, %p848_p0  ;;  %p945_p3 = por %p944_p2, %p943_p1 }
  0x44   : > { %p939_p12 = pneg %p938_p9 }
  0x46   : > { %p946_p8 = pnand %p945_p3, %p939_p12 }
  0x48   : > { %949 = shalt.err (!%p946_p8)
}
  0x49   : > { %777 = dma.hbm_to_vmem [thread:$0]  (!%p1140_p13), %s1251_s3, 2048, %s211_s11, [#allocation9], %s1043_s5, %s1043_s5, %s1044_s6  }
  0x4a   : > { %p1262_p5 = scmp.ne.s32.totalorder %s1259_s29, 0 }
  0x4b   : > { %p1263_p6 = scmp.ne.s32.totalorder (!%p1262_p5), %s1260_s30, 0 }
  0x4c   : > { %226 = sbr.rel (%p1262_p5) target bundleno = 317 (0x13d), region = 36 }
  0x51   : > { %1001 = dma.done.wait (%p1263_p6), [#allocation3], 128  }
  0x52   : > { %1003 = vsyncadd (%p1263_p6), [#allocation3], 4294967168 }
  0x53   : > { %1005 = dma.done.wait (%p1263_p6), [#allocation6], 4224  }
  0x54   : > { %1007 = vsyncadd (%p1263_p6), [#allocation6], 4294963072 }
  0x55   : > { %1009 = dma.done.wait (%p1263_p6), [#allocation9], 2048  }
  0x56   : > { %1011 = vsyncadd (%p1263_p6), [#allocation9], 4294965248  ;;  %s734_s29 = sshll.u32 %s1030_s18, 9  ;;  %v1046_v0 = vmov 0.0   ;;  %v261_v17 = vld [vmem:[#allocation2] sm:$0xff]  ;;  %vm282_vm0 = vcmask 261120  }
  0x57   : > { %s1195_s7 = sshra.s32 %s734_s29, 7  ;;  %350 = vmatprep.mubr.f32.mxu0 %v1046_v0  ;;  %421 = vmatprep.mubr.f32.mxu1 %v1046_v0  ;;  %v428_v26 = vld [vmem:[#allocation5] sm:$0xff]  ;;  %vm439_vm1 = vcmask 130048   ;;  %s256_s24 = sand.u32 1, %s1022_s16  }
  0x58   : > { %s735_s21 = sshll.u32 %s1195_s7, 3  ;;  %s733_s26 = sshll.u32 %s256_s24, 5 }
  0x59   : > { %s265_s22 = scalar_lea.vmem [#allocation7], %s735_s21  ;;  %s430_s30 = scalar_lea.vmem [#allocation8], %s735_s21 }
  0x5a   : > { %v279_v1 = vld [vmem:[%s265_s22 + $0xc8] sm:$0xff]  ;;  %v281_v2 = vld [vmem:[%s265_s22 + $0xd8] sm:$0xff]  ;;  %v278_v3 = vld [vmem:[%s265_s22 + $0xc0] sm:$0xff]  ;;  %s258_s5 = scalar_lea.vmem [#allocation10], %s733_s26  ;;  %s1208_s10 = scalar_lea.hbm %s1252_s4, %s734_s29 }
  0x5b   : > { %310 = vmatprep.subr.mxu0 %v279_v1  ;;  %381 = vmatprep.subr.mxu1 %v281_v2  ;;  %v280_v4 = vld [vmem:[%s265_s22 + $0xd0] sm:$0xff]  ;;  %v275_v5 = vld [vmem:[%s265_s22 + $0x88] sm:$0xff]  ;;  %v277_v6 = vld [vmem:[%s265_s22 + $0x98] sm:$0xff]  ;;  %s614_s6 = sshll.u32 %s258_s5, 4  ;;  %s598_s11 = scalar_lea.sflag [#allocation4], %s256_s24  ;;  %s615_s6 = int_to_ptr.vmem [resolvable:$true] %s614_s6 }
  0x5c   : > { %311 = vmatpush1.msra.mxu0 %v278_v3  ;;  %382 = vmatpush1.msra.mxu1 %v280_v4  ;;  %v274_v7 = vld [vmem:[%s265_s22 + $0x80] sm:$0xff]  ;;  %v276_v8 = vld [vmem:[%s265_s22 + $0x90] sm:$0xff]  ;;  %v271_v9 = vld [vmem:[%s265_s22 + $0x48] sm:$0xff]  ;;  %s950_s12 = scalar_lea.vmem %s615_s6, 512  ;;  %p1264_p0 = scmp.ne.s32.totalorder %s1257_s25, 0 }
  0x5d   : > { %312 = vmatprep.subr.mxu0 %v275_v5  ;;  %383 = vmatprep.subr.mxu1 %v277_v6  ;;  %v273_v10 = vld [vmem:[%s265_s22 + $0x58] sm:$0xff]  ;;  %v270_v11 = vld [vmem:[%s265_s22 + $0x40] sm:$0xff]  ;;  %v272_v12 = vld [vmem:[%s265_s22 + $0x50] sm:$0xff]  ;;  %p951_p13 = scmp.ne.s32.totalorder %s615_s6, %s950_s12  ;;  %s1047_s13 = smov [#allocation10]  }
  0x5e   : > { %313 = vmatpush1.msra.mxu0 %v274_v7  ;;  %384 = vmatpush1.msra.mxu1 %v276_v8  ;;  %v267_v13 = vld [vmem:[%s265_s22 + $0x8] sm:$0xff]  ;;  %v269_v14 = vld [vmem:[%s265_s22 + $0x18] sm:$0xff]  ;;  %v266_v15 = vld [vmem:[%s265_s22] sm:$0xff]  ;;  %s954_s14 = sshll.u32 %s1047_s13, 4  ;;  %s955_s14 = int_to_ptr.vmem [resolvable:$false] %s954_s14 }
  0x5f   : > { %314 = vmatprep.subr.mxu0 %v271_v9  ;;  %385 = vmatprep.subr.mxu1 %v273_v10  ;;  %v268_v16 = vld [vmem:[%s265_s22 + $0x10] sm:$0xff]  ;;  %v436_v18 = vld [vmem:[%s430_s30 + $0x48] sm:$0xff]  ;;  %v438_v19 = vld [vmem:[%s430_s30 + $0x58] sm:$0xff]  ;;  %p952_p7 = pnand %p951_p13, %p1264_p0  ;;  %s956_s7 = scalar_lea.vmem %s955_s14, 1024 }
  0x60   : > { %315 = vmatpush1.msra.mxu0 %v270_v11  ;;  %386 = vmatpush1.msra.mxu1 %v272_v12  ;;  %v435_v20 = vld [vmem:[%s430_s30 + $0x40] sm:$0xff]  ;;  %v437_v21 = vld [vmem:[%s430_s30 + $0x50] sm:$0xff]  ;;  %v432_v22 = vld [vmem:[%s430_s30 + $0x8] sm:$0xff]  ;;  %p957_p10 = scmp.lt.s32.totalorder %s615_s6, %s955_s14  ;;  %p958_p11 = scmp.lt.s32.totalorder %s956_s7, %s950_s12 }
  0x61   : > { %316 = vmatprep.subr.mxu0 %v267_v13  ;;  %387 = vmatprep.subr.mxu1 %v269_v14  ;;  %v434_v23 = vld [vmem:[%s430_s30 + $0x18] sm:$0xff]  ;;  %v431_v24 = vld [vmem:[%s430_s30] sm:$0xff]  ;;  %v433_v25 = vld [vmem:[%s430_s30 + $0x10] sm:$0xff]  ;;  %p953_p4 = pneg %p952_p7 }
  0x62   : > { %317 = vmatpush1.msra.mxu0 %v266_v15  ;;  %388 = vmatpush1.msra.mxu1 %v268_v16  ;;  %p959_p9 = por %p958_p11, %p957_p10 }
  0x63   : > { %736 = vmatmul.mubr.msk.f32.vlgmr.msra.gmra.mxu0 %vm282_vm0, %v261_v17  ;;  %737 = vmatmul.mubr.msk.f32.vlgmr.msra.gmra.mxu1 %vm282_vm0, %v261_v17 }
  0x64   : > { %471 = vmatprep.subr.mxu0 %v436_v18  ;;  %542 = vmatprep.subr.mxu1 %v438_v19  ;;  %p960_p12 = pnand %p959_p9, %p953_p4 }
  0x65   : > { %472 = vmatpush1.msra.mxu0 %v435_v20  ;;  %543 = vmatpush1.msra.mxu1 %v437_v21 }
  0x66   : > { %473 = vmatprep.subr.mxu0 %v432_v22  ;;  %544 = vmatprep.subr.mxu1 %v434_v23 }
  0x67   : > { %474 = vmatpush1.msra.mxu0 %v431_v24  ;;  %507 = vmatprep.mubr.f32.mxu0 %v1046_v0 }
  0x68   : > { %545 = vmatpush1.msra.mxu1 %v433_v25  ;;  %578 = vmatprep.mubr.f32.mxu1 %v1046_v0 }
  0x69   : > { %739 = vmatmul.mubr.msk.f32.vlgmr.msra.gmra.mxu0 %vm439_vm1, %v428_v26  ;;  %740 = vmatmul.mubr.msk.f32.vlgmr.msra.gmra.mxu1 %vm439_vm1, %v428_v26 }
 0x123   : > { %v352_v27 = vpop.f32.mrf.mxu0  ;;  %v423_v28 = vpop.f32.mrf.mxu1 }
 0x125   : > { %v354_v29 = vpop.f32.mrf.mxu0  ;;  %v425_v30 = vpop.f32.mrf.mxu1 }
 0x129   : > { %v509_v31 = vpop.f32.mrf.mxu0  ;;  %v580_v32 = vpop.f32.mrf.mxu1 }
 0x12a   : > { %v585_v33 = vmul.f32 %v509_v31, %v352_v27  ;;  %v587_v34 = vmul.f32 %v580_v32, %v423_v28 }
 0x12b   : > { %v511_v35 = vpop.f32.mrf.mxu0  ;;  %v582_v36 = vpop.f32.mrf.mxu1 }
 0x12c   : > { %v589_v37 = vmul.f32 0.03125, %v585_v33  ;;  %v591_v38 = vmul.f32 0.03125, %v587_v34  ;;  %v586_v39 = vmul.f32 %v511_v35, %v354_v29  ;;  %v588_v40 = vmul.f32 %v582_v36, %v425_v30 }
 0x12e   : > { %593 = vst [vmem:[%s258_s5] sm:$0xff] %v589_v37  ;;  %595 = vst [vmem:[%s258_s5 + $0x10] sm:$0xff] %v591_v38  ;;  %v590_v41 = vmul.f32 0.03125, %v586_v39  ;;  %v592_v42 = vmul.f32 0.03125, %v588_v40 }
 0x130   : > { %594 = vst [vmem:[%s258_s5 + $0x8] sm:$0xff] %v590_v41  ;;  %596 = vst [vmem:[%s258_s5 + $0x18] sm:$0xff] %v592_v42 }
 0x131   : > { %963 = shalt.err (!%p960_p12)
}
 0x132   : > { %s964_s18 = scalar_lea.hbm %s1208_s10, 512  ;;  %s968_s22 = scalar_lea.hbm %s1252_s4, 1024 }
 0x133   : > { %p965_p1 = scmp.ne.s32.totalorder %s1208_s10, %s964_s18  ;;  %p969_p8 = scmp.lt.s32.totalorder %s1208_s10, %s1252_s4 }
 0x134   : > { %p970_p5 = scmp.lt.s32.totalorder %s968_s22, %s964_s18 }
 0x135   : > { %p966_p2 = pnand %p965_p1, %p1264_p0 }
 0x136   : > { %p971_p6 = por %p970_p5, %p969_p8 }
 0x137   : > { %p967_p3 = pneg %p966_p2 }
 0x139   : > { %p972_p13 = pnand %p971_p6, %p967_p3 }
 0x13b   : > { %975 = shalt.err (!%p972_p13)
}
 0x13c   : > { %763 = dma.vmem_to_hbm [thread:$0]  (%p1264_p0), %s615_s6, 512, %s1208_s10, %s598_s11  }
 0x13d PF: > { %p790_p7 = scmp.ge.s32.totalorder %s1038_s20, 2  ;;  %s626_s26 = sand.u32 1, %s1018_s15  }
 0x13e   : > { %p1265_p4 = scmp.ne.s32.totalorder %s1258_s27, 0  ;;  %s627_s5 = scalar_lea.sflag [#allocation4], %s626_s26 }
 0x140   : > { %p779_p10 = pnand %p790_p7, %p1265_p4 }
 0x142   : > { %p780_p11 = pneg %p779_p10 }
 0x144   : > { %1013 = dma.done.wait (%p780_p11), %s627_s5, 512  }
 0x145   : > { %1015 = vsyncadd (%p780_p11), %s627_s5, 4294966784  ;;  %s20_s20 = sadd.s32 1, %s1038_s20   ;;  %s1266_s15 = smov %s1022_s16 }
 0x146   : > { %p17_p9 = scmp.ge.s32.totalorder %s20_s20, 4   ;;  %s1267_s16 = smov %s1026_s17 }
 0x147   : > { %s1268_s17 = smov %s1126_s28  ;;  %s1269_s18 = smov %s1034_s19 }
 0x148   : > { %s1270_s19 = smov %s1272_s23  ;;  %19 = sbr.rel (!%p17_p9) target bundleno = 7 (0x7), region = 89 }
 0x14d   :  { %632 = vsyncpa [#allocation3], 1 }
 0x14e   :  { %634 = vsyncpa [#allocation3 + $0x1], 1 }
 0x14f   :  { %635 = vsyncpa [#allocation6], 1 }
 0x150   :  { %636 = vsyncpa [#allocation9], 1 }
 0x151   :  { %637 = vsyncpa [#allocation4], 1 }
 0x152   :  { %639 = vsyncpa [#allocation4 + $0x1], 1 }

</bundles_post_ra>
